<compile_context>
chip_gen: v7x
topology: tpu7x:2x2x1
jax: 0.10.0
libtpu: 0.0.40
codegen_flags: <defaults>
</compile_context>

<pallas_src>
import functools

import jax
import jax.numpy as jnp
from jax.experimental import pallas as pl
from jax.experimental.pallas import tpu as pltpu

LANES = 128
MAX_BLOCK_ROWS = 2048   # (2048, 128) f32 = 1 MiB per input stream per buffer
ACC_ROWS = 512          # fixed accumulator height (decoupled from block_rows)


def _round_up(x, m):
    return ((x + m - 1) // m) * m


def _core_config():
    """(num_tensorcores, grid-semantics for the core axis) for this device."""
    try:
        kind = jax.devices()[0].device_kind.lower().replace(" ", "")
    except Exception:
        return 1, pltpu.ARBITRARY
    if "v7" in kind:                                   # 2 TensorCores per chip
        return 2, pltpu.CORE_PARALLEL
    if "v4" in kind or "v5p" in kind or kind.endswith("v5"):   # megacore chips
        return 2, pltpu.PARALLEL
    return 1, pltpu.ARBITRARY                          # v2/v3/v5e/v6e: 1 TC


def _bce_loss_kernel(pred_ref, tgt_ref, out_ref, acc_l0, acc_c, acc_s, *,
                     n_valid, block_rows, acc_rows):
    c = pl.program_id(0)
    s = pl.program_id(1)
    n_steps = pl.num_programs(1)

    @pl.when(s == 0)
    def _():
        acc_l0[...] = jnp.zeros_like(acc_l0)
        acc_c[...] = jnp.zeros_like(acc_c)
        acc_s[...] = jnp.zeros_like(acc_s)

    x = pred_ref[...].astype(jnp.float32)
    t = tgt_ref[...].astype(jnp.float32)   # targets may stream as bf16/int8

    # Numerically-stable softplus(-x) = max(-x, 0) + log1p(exp(-|x|)).
    sp = jnp.maximum(-x, 0.0) + jnp.log1p(jnp.exp(-jnp.abs(x)))
    l0 = x - t * x + sp                     # (1 - t)*x + softplus(-x)
    ts = t * sp                             # t * softplus(-x)

    n_chunks = block_rows // acc_rows

    def fold(l0v, tsv, tv):
        # Fold the (block_rows, LANES) tile into fixed-height per-lane
        # accumulators: pure VPU adds, small static unroll.
        for k in range(n_chunks):
            lo = k * acc_rows
            acc_l0[...] += l0v[lo:lo + acc_rows, :]
            acc_c[...] += tsv[lo:lo + acc_rows, :]
            acc_s[...] += tv[lo:lo + acc_rows, :]

    blk = c * n_steps + s
    block_elems = block_rows * LANES
    fully_valid = (blk + 1) * block_elems <= n_valid

    @pl.when(fully_valid)
    def _():
        # Hot path: interior blocks, no mask work at all.
        fold(l0, ts, t)

    @pl.when(jnp.logical_not(fully_valid))
    def _():
        # Ragged tail / clamped overshoot blocks only. jnp.where (not multiply)
        # so undefined data in partial edge blocks cannot poison the sums.
        row = jax.lax.broadcasted_iota(jnp.int32, (block_rows, LANES), 0)
        lane = jax.lax.broadcasted_iota(jnp.int32, (block_rows, LANES), 1)
        idx = blk * block_elems + row * LANES + lane
        valid = idx < n_valid
        zeros = jnp.zeros_like(l0)
        fold(jnp.where(valid, l0, zeros),
             jnp.where(valid, ts, zeros),
             jnp.where(valid, t, zeros))

    @pl.when(s == n_steps - 1)
    def _():
        # One cross-sublane reduction per core; per-lane partials kept.
        out_ref[0, 0:1, :] = jnp.sum(acc_l0[...], axis=0, keepdims=True)
        out_ref[0, 1:2, :] = jnp.sum(acc_c[...], axis=0, keepdims=True)
        out_ref[0, 2:3, :] = jnp.sum(acc_s[...], axis=0, keepdims=True)


def _partial_sums(pred2d, tgt2d, n, block_rows, acc_rows, num_cores, core_sem):
    rows = pred2d.shape[0]
    num_blocks = _round_up(rows, block_rows) // block_rows
    steps = _round_up(num_blocks, num_cores) // num_cores

    def in_index_map(c, s):
        # Clamp: overshoot iterations re-read the last block; the in-kernel
        # masked path zeroes their contribution.
        return (jnp.minimum(c * steps + s, num_blocks - 1), 0)

    tile_spec = pl.BlockSpec((block_rows, LANES), in_index_map)

    return pl.pallas_call(
        functools.partial(_bce_loss_kernel, n_valid=n,
                          block_rows=block_rows, acc_rows=acc_rows),
        out_shape=jax.ShapeDtypeStruct((num_cores, 3, LANES), jnp.float32),
        grid_spec=pltpu.PrefetchScalarGridSpec(
            num_scalar_prefetch=0,
            grid=(num_cores, steps),
            in_specs=[tile_spec, tile_spec],
            out_specs=pl.BlockSpec((1, 3, LANES), lambda c, s: (c, 0, 0)),
            scratch_shapes=[
                pltpu.VMEM((acc_rows, LANES), jnp.float32),
                pltpu.VMEM((acc_rows, LANES), jnp.float32),
                pltpu.VMEM((acc_rows, LANES), jnp.float32),
            ],
        ),
        compiler_params=pltpu.CompilerParams(
            dimension_semantics=(core_sem, pltpu.ARBITRARY)),
    )(pred2d, tgt2d)


def bc_loss(pred, target):
    """Pallas implementation of BCLoss.forward. Returns a scalar float32."""
    n = pred.size
    pred_flat = jnp.reshape(pred, (-1,))
    tgt_flat = jnp.reshape(target, (-1,))   # dtype preserved (bf16/int8 OK)

    rows_raw = _round_up(max(n, 1), LANES) // LANES
    # Round block rows to 32 sublanes (safe for f32 / bf16 / int8 tiling).
    block_rows = min(MAX_BLOCK_ROWS, _round_up(rows_raw, 32))
    rows = max(rows_raw, block_rows)
    acc_rows = ACC_ROWS if block_rows % ACC_ROWS == 0 else block_rows

    pad = rows * LANES - n
    if pad:  # only for tiny or non-128-divisible inputs; masked in-kernel
        pred_flat = jnp.pad(pred_flat, (0, pad))
        tgt_flat = jnp.pad(tgt_flat, (0, pad))

    pred2d = pred_flat.reshape(rows, LANES)
    tgt2d = tgt_flat.reshape(rows, LANES)

    num_cores, core_sem = _core_config()
    try:
        out = _partial_sums(pred2d, tgt2d, n, block_rows, acc_rows,
                            num_cores, core_sem)
    except Exception:
        # Conservative fallback: single-core serial reduction always works.
        if num_cores == 1:
            raise
        out = _partial_sums(pred2d, tgt2d, n, block_rows, acc_rows,
                            1, pltpu.ARBITRARY)

    sums = jnp.sum(out, axis=(0, 2))          # [L0, C, S]
    l0, c_sum, s_sum = sums[0], sums[1], sums[2]
    n_f = jnp.float32(n)
    # Matches the PyTorch module exactly: if target has no positives,
    # pos_weight (and the loss) is inf, same as the reference.
    pos_weight = (n_f - s_sum) / s_sum
    return (l0 + (pos_weight - 1.0) * c_sum) / n_f


def _bc_loss_ref(pred, target):
    """Pure-JAX reference (mirrors torch.nn.BCEWithLogitsLoss w/ pos_weight)."""
    x = jnp.reshape(pred, (-1,)).astype(jnp.float32)
    t = jnp.reshape(target, (-1,)).astype(jnp.float32)
    n = x.shape[0]
    s = jnp.sum(t)
    pw = (n - s) / s
    sp = jnp.maximum(-x, 0.0) + jnp.log1p(jnp.exp(-jnp.abs(x)))
    per = (1.0 - t) * x + (1.0 + (pw - 1.0) * t) * sp
    return jnp.mean(per)


if __name__ == "__main__":
    key = jax.random.PRNGKey(0)
    k1, k2, k3, k4, k5, k6 = jax.random.split(key, 6)

    # Onset-prediction head: (batch, channels, H, W) logits / binary targets.
    pred = jax.random.normal(k1, (2, 4, 16, 16), dtype=jnp.float32)
    target = (jax.random.uniform(k2, (2, 4, 16, 16)) < 0.1).astype(jnp.float32)
    target = target.at[0, 0, 0, 0].set(1.0)   # guarantee >= 1 positive

    loss = jax.block_until_ready(bc_loss(pred, target))
    ref = jax.block_until_ready(_bc_loss_ref(pred, target))
    assert jnp.isfinite(loss), "loss is not finite"
    assert jnp.allclose(loss, ref, rtol=1e-4, atol=1e-5), (loss, ref)

    # Ragged element count + narrow (bfloat16) binary targets: exercises the
    # pad / masked-tail path and the reduced-bandwidth target stream.
    pred2 = jax.random.normal(k3, (2, 3, 15, 11), dtype=jnp.float32)
    target2 = (jax.random.uniform(k4, (2, 3, 15, 11)) < 0.2).astype(jnp.bfloat16)
    target2 = target2.at[0, 0, 0, 0].set(1.0)

    loss2 = jax.block_until_ready(bc_loss(pred2, target2))
    ref2 = jax.block_until_ready(_bc_loss_ref(pred2, target2))
    assert jnp.isfinite(loss2), "loss2 is not finite"
    assert jnp.allclose(loss2, ref2, rtol=1e-4, atol=1e-5), (loss2, ref2)

    # Larger case: multiple grid steps, unmasked interior block hot path and
    # the chunk-folded fixed-height accumulators.
    pred3 = jax.random.normal(k5, (2, 4, 160, 256), dtype=jnp.float32)
    target3 = (jax.random.uniform(k6, (2, 4, 160, 256)) < 0.1).astype(jnp.float32)
    target3 = target3.at[0, 0, 0, 0].set(1.0)

    loss3 = jax.block_until_ready(bc_loss(pred3, target3))
    ref3 = jax.block_until_ready(_bc_loss_ref(pred3, target3))
    assert jnp.isfinite(loss3), "loss3 is not finite"
    assert jnp.allclose(loss3, ref3, rtol=1e-4, atol=1e-5), (loss3, ref3)

    print("KERNEL_OK")
</pallas_src>

<mosaic_0001>
module attributes {stable_mosaic.version = 11 : i64} {
  func.func @_bce_loss_kernel(%arg0: i32, %arg1: i32, %arg2: memref<32x128xf32, #tpu.memory_space<vmem>>, %arg3: memref<32x128xf32, #tpu.memory_space<vmem>>, %arg4: memref<1x3x128xf32, #tpu.memory_space<vmem>>, %arg5: memref<32x128xf32, #tpu.memory_space<vmem>>, %arg6: memref<32x128xf32, #tpu.memory_space<vmem>>, %arg7: memref<32x128xf32, #tpu.memory_space<vmem>>) attributes {dimension_semantics = [#tpu.dimension_semantics<arbitrary>, #tpu.dimension_semantics<arbitrary>], iteration_bounds = array<i64: 1, 1>, scalar_prefetch = 0 : i64, scratch_operands = 3 : i64, tpu.core_type = #tpu.core_type<tc>, window_params = [{transform_indices = @transform_0, window_bounds = array<i64: 32, 128>}, {transform_indices = @transform_1, window_bounds = array<i64: 32, 128>}, {transform_indices = @transform_2, window_bounds = array<i64: 1, 3, 128>}]} {
    %c0_i32 = arith.constant 0 : i32
    %0 = arith.cmpi eq, %arg1, %c0_i32 : i32
    %1 = arith.extui %0 : i1 to i32
    %c0_i32_0 = arith.constant 0 : i32
    %2 = arith.cmpi ne, %1, %c0_i32_0 : i32
    scf.if %2 {
      %cst_11 = arith.constant 0.000000e+00 : f32
      %32 = vector.broadcast %cst_11 : f32 to vector<32x128xf32>
      %c0_12 = arith.constant 0 : index
      %c0_13 = arith.constant 0 : index
      %33 = vector.load %arg5[%c0_12, %c0_13] : memref<32x128xf32, #tpu.memory_space<vmem>>, vector<32x128xf32>
      tpu.vector_store %arg5[%c0_12, %c0_13], %32 {strides = array<i32>} : memref<32x128xf32, #tpu.memory_space<vmem>>, vector<32x128xf32>,
      %cst_14 = arith.constant 0.000000e+00 : f32
      %34 = vector.broadcast %cst_14 : f32 to vector<32x128xf32>
      %c0_15 = arith.constant 0 : index
      %c0_16 = arith.constant 0 : index
      %35 = vector.load %arg6[%c0_15, %c0_16] : memref<32x128xf32, #tpu.memory_space<vmem>>, vector<32x128xf32>
      tpu.vector_store %arg6[%c0_15, %c0_16], %34 {strides = array<i32>} : memref<32x128xf32, #tpu.memory_space<vmem>>, vector<32x128xf32>,
      %cst_17 = arith.constant 0.000000e+00 : f32
      %36 = vector.broadcast %cst_17 : f32 to vector<32x128xf32>
      %c0_18 = arith.constant 0 : index
      %c0_19 = arith.constant 0 : index
      %37 = vector.load %arg7[%c0_18, %c0_19] : memref<32x128xf32, #tpu.memory_space<vmem>>, vector<32x128xf32>
      tpu.vector_store %arg7[%c0_18, %c0_19], %36 {strides = array<i32>} : memref<32x128xf32, #tpu.memory_space<vmem>>, vector<32x128xf32>,
    } else {
    }
    %c0 = arith.constant 0 : index
    %c0_1 = arith.constant 0 : index
    %3 = vector.load %arg2[%c0, %c0_1] : memref<32x128xf32, #tpu.memory_space<vmem>>, vector<32x128xf32>
    %c0_2 = arith.constant 0 : index
    %c0_3 = arith.constant 0 : index
    %4 = vector.load %arg3[%c0_2, %c0_3] : memref<32x128xf32, #tpu.memory_space<vmem>>, vector<32x128xf32>
    %cst = arith.constant 0.000000e+00 : f32
    %5 = vector.broadcast %cst : f32 to vector<32x128xf32>
    %6 = arith.subf %5, %3 : vector<32x128xf32>
    %cst_4 = arith.constant 0.000000e+00 : f32
    %7 = vector.broadcast %cst_4 : f32 to vector<32x128xf32>
    %8 = arith.maximumf %6, %7 : vector<32x128xf32>
    %9 = math.absf %3 : vector<32x128xf32>
    %cst_5 = arith.constant 0.000000e+00 : f32
    %10 = vector.broadcast %cst_5 : f32 to vector<32x128xf32>
    %11 = arith.subf %10, %9 : vector<32x128xf32>
    %12 = math.exp %11 : vector<32x128xf32>
    %13 = math.log1p %12 : vector<32x128xf32>
    %14 = arith.addf %8, %13 : vector<32x128xf32>
    %15 = arith.mulf %4, %3 : vector<32x128xf32>
    %16 = arith.subf %3, %15 : vector<32x128xf32>
    %17 = arith.addf %16, %14 : vector<32x128xf32>
    %18 = arith.mulf %4, %14 : vector<32x128xf32>
    %c1_i32 = arith.constant 1 : i32
    %19 = arith.muli %arg0, %c1_i32 : i32
    %20 = arith.addi %19, %arg1 : i32
    %c1_i32_6 = arith.constant 1 : i32
    %21 = arith.addi %20, %c1_i32_6 : i32
    %c4096_i32 = arith.constant 4096 : i32
    %22 = arith.muli %21, %c4096_i32 : i32
    %c2048_i32 = arith.constant 2048 : i32
    %23 = arith.cmpi sle, %22, %c2048_i32 : i32
    %24 = arith.extui %23 : i1 to i32
    %c0_i32_7 = arith.constant 0 : i32
    %25 = arith.cmpi ne, %24, %c0_i32_7 : i32
    scf.if %25 {
      %c0_11 = arith.constant 0 : index
      %c0_12 = arith.constant 0 : index
      %32 = vector.load %arg5[%c0_11, %c0_12] : memref<32x128xf32, #tpu.memory_space<vmem>>, vector<32x128xf32>
      %33 = arith.addf %32, %17 : vector<32x128xf32>
      %c0_13 = arith.constant 0 : index
      %c0_14 = arith.constant 0 : index
      %34 = vector.load %arg5[%c0_13, %c0_14] : memref<32x128xf32, #tpu.memory_space<vmem>>, vector<32x128xf32>
      tpu.vector_store %arg5[%c0_13, %c0_14], %33 {strides = array<i32>} : memref<32x128xf32, #tpu.memory_space<vmem>>, vector<32x128xf32>,
      %c0_15 = arith.constant 0 : index
      %c0_16 = arith.constant 0 : index
      %35 = vector.load %arg6[%c0_15, %c0_16] : memref<32x128xf32, #tpu.memory_space<vmem>>, vector<32x128xf32>
      %36 = arith.addf %35, %18 : vector<32x128xf32>
      %c0_17 = arith.constant 0 : index
      %c0_18 = arith.constant 0 : index
      %37 = vector.load %arg6[%c0_17, %c0_18] : memref<32x128xf32, #tpu.memory_space<vmem>>, vector<32x128xf32>
      tpu.vector_store %arg6[%c0_17, %c0_18], %36 {strides = array<i32>} : memref<32x128xf32, #tpu.memory_space<vmem>>, vector<32x128xf32>,
      %c0_19 = arith.constant 0 : index
      %c0_20 = arith.constant 0 : index
      %38 = vector.load %arg7[%c0_19, %c0_20] : memref<32x128xf32, #tpu.memory_space<vmem>>, vector<32x128xf32>
      %39 = arith.addf %38, %4 : vector<32x128xf32>
      %c0_21 = arith.constant 0 : index
      %c0_22 = arith.constant 0 : index
      %40 = vector.load %arg7[%c0_21, %c0_22] : memref<32x128xf32, #tpu.memory_space<vmem>>, vector<32x128xf32>
      tpu.vector_store %arg7[%c0_21, %c0_22], %39 {strides = array<i32>} : memref<32x128xf32, #tpu.memory_space<vmem>>, vector<32x128xf32>,
    } else {
    }
    %true = arith.constant true
    %26 = arith.xori %23, %true : i1
    %27 = arith.extui %26 : i1 to i32
    %c0_i32_8 = arith.constant 0 : i32
    %28 = arith.cmpi ne, %27, %c0_i32_8 : i32
    scf.if %28 {
      %32 = tpu.iota {dimensions = array<i32: 0>} : vector<32x128xi32>
      %33 = tpu.iota {dimensions = array<i32: 1>} : vector<32x128xi32>
      %c4096_i32_11 = arith.constant 4096 : i32
      %34 = arith.muli %20, %c4096_i32_11 : i32
      %c128_i32 = arith.constant 128 : i32
      %35 = vector.broadcast %c128_i32 : i32 to vector<32x128xi32>
      %36 = arith.muli %32, %35 : vector<32x128xi32>
      %37 = vector.broadcast %34 : i32 to vector<32x128xi32>
      %38 = arith.addi %37, %36 : vector<32x128xi32>
      %39 = arith.addi %38, %33 : vector<32x128xi32>
      %c2048_i32_12 = arith.constant 2048 : i32
      %40 = vector.broadcast %c2048_i32_12 : i32 to vector<32x128xi32>
      %41 = arith.cmpi slt, %39, %40 : vector<32x128xi32>
      %cst_13 = arith.constant 0.000000e+00 : f32
      %42 = vector.broadcast %cst_13 : f32 to vector<32x128xf32>
      %43 = arith.select %41, %17, %42 : vector<32x128xi1>, vector<32x128xf32>
      %44 = arith.select %41, %18, %42 : vector<32x128xi1>, vector<32x128xf32>
      %45 = arith.select %41, %4, %42 : vector<32x128xi1>, vector<32x128xf32>
      %c0_14 = arith.constant 0 : index
      %c0_15 = arith.constant 0 : index
      %46 = vector.load %arg5[%c0_14, %c0_15] : memref<32x128xf32, #tpu.memory_space<vmem>>, vector<32x128xf32>
      %47 = arith.addf %46, %43 : vector<32x128xf32>
      %c0_16 = arith.constant 0 : index
      %c0_17 = arith.constant 0 : index
      %48 = vector.load %arg5[%c0_16, %c0_17] : memref<32x128xf32, #tpu.memory_space<vmem>>, vector<32x128xf32>
      tpu.vector_store %arg5[%c0_16, %c0_17], %47 {strides = array<i32>} : memref<32x128xf32, #tpu.memory_space<vmem>>, vector<32x128xf32>,
      %c0_18 = arith.constant 0 : index
      %c0_19 = arith.constant 0 : index
      %49 = vector.load %arg6[%c0_18, %c0_19] : memref<32x128xf32, #tpu.memory_space<vmem>>, vector<32x128xf32>
      %50 = arith.addf %49, %44 : vector<32x128xf32>
      %c0_20 = arith.constant 0 : index
      %c0_21 = arith.constant 0 : index
      %51 = vector.load %arg6[%c0_20, %c0_21] : memref<32x128xf32, #tpu.memory_space<vmem>>, vector<32x128xf32>
      tpu.vector_store %arg6[%c0_20, %c0_21], %50 {strides = array<i32>} : memref<32x128xf32, #tpu.memory_space<vmem>>, vector<32x128xf32>,
      %c0_22 = arith.constant 0 : index
      %c0_23 = arith.constant 0 : index
      %52 = vector.load %arg7[%c0_22, %c0_23] : memref<32x128xf32, #tpu.memory_space<vmem>>, vector<32x128xf32>
      %53 = arith.addf %52, %45 : vector<32x128xf32>
      %c0_24 = arith.constant 0 : index
      %c0_25 = arith.constant 0 : index
      %54 = vector.load %arg7[%c0_24, %c0_25] : memref<32x128xf32, #tpu.memory_space<vmem>>, vector<32x128xf32>
      tpu.vector_store %arg7[%c0_24, %c0_25], %53 {strides = array<i32>} : memref<32x128xf32, #tpu.memory_space<vmem>>, vector<32x128xf32>,
    } else {
    }
    %c0_i32_9 = arith.constant 0 : i32
    %29 = arith.cmpi eq, %arg1, %c0_i32_9 : i32
    %30 = arith.extui %29 : i1 to i32
    %c0_i32_10 = arith.constant 0 : i32
    %31 = arith.cmpi ne, %30, %c0_i32_10 : i32
    scf.if %31 {
      %c0_11 = arith.constant 0 : index
      %c0_12 = arith.constant 0 : index
      %32 = vector.load %arg5[%c0_11, %c0_12] : memref<32x128xf32, #tpu.memory_space<vmem>>, vector<32x128xf32>
      %cst_13 = arith.constant dense<0.000000e+00> : vector<128xf32>
      %33 = vector.multi_reduction <add>, %32, %cst_13 [0] : vector<32x128xf32> to vector<128xf32>
      %34 = vector.shape_cast %33 : vector<128xf32> to vector<1x128xf32>
      %c0_14 = arith.constant 0 : index
      %c0_15 = arith.constant 0 : index
      %c0_16 = arith.constant 0 : index
      %35 = vector.load %arg4[%c0_14, %c0_15, %c0_16] : memref<1x3x128xf32, #tpu.memory_space<vmem>>, vector<1x1x128xf32>
      %36 = vector.shape_cast %35 : vector<1x1x128xf32> to vector<1x128xf32>
      %37 = vector.shape_cast %34 : vector<1x128xf32> to vector<1x1x128xf32>
      tpu.vector_store %arg4[%c0_14, %c0_15, %c0_16], %37 {strides = array<i32>} : memref<1x3x128xf32, #tpu.memory_space<vmem>>, vector<1x1x128xf32>,
      %c0_17 = arith.constant 0 : index
      %c0_18 = arith.constant 0 : index
      %38 = vector.load %arg6[%c0_17, %c0_18] : memref<32x128xf32, #tpu.memory_space<vmem>>, vector<32x128xf32>
      %cst_19 = arith.constant dense<0.000000e+00> : vector<128xf32>
      %39 = vector.multi_reduction <add>, %38, %cst_19 [0] : vector<32x128xf32> to vector<128xf32>
      %40 = vector.shape_cast %39 : vector<128xf32> to vector<1x128xf32>
      %c0_20 = arith.constant 0 : index
      %c1 = arith.constant 1 : index
      %c0_21 = arith.constant 0 : index
      %41 = vector.load %arg4[%c0_20, %c1, %c0_21] : memref<1x3x128xf32, #tpu.memory_space<vmem>>, vector<1x1x128xf32>
      %42 = vector.shape_cast %41 : vector<1x1x128xf32> to vector<1x128xf32>
      %43 = vector.shape_cast %40 : vector<1x128xf32> to vector<1x1x128xf32>
      tpu.vector_store %arg4[%c0_20, %c1, %c0_21], %43 {strides = array<i32>} : memref<1x3x128xf32, #tpu.memory_space<vmem>>, vector<1x1x128xf32>,
      %c0_22 = arith.constant 0 : index
      %c0_23 = arith.constant 0 : index
      %44 = vector.load %arg7[%c0_22, %c0_23] : memref<32x128xf32, #tpu.memory_space<vmem>>, vector<32x128xf32>
      %cst_24 = arith.constant dense<0.000000e+00> : vector<128xf32>
      %45 = vector.multi_reduction <add>, %44, %cst_24 [0] : vector<32x128xf32> to vector<128xf32>
      %46 = vector.shape_cast %45 : vector<128xf32> to vector<1x128xf32>
      %c0_25 = arith.constant 0 : index
      %c2 = arith.constant 2 : index
      %c0_26 = arith.constant 0 : index
      %47 = vector.load %arg4[%c0_25, %c2, %c0_26] : memref<1x3x128xf32, #tpu.memory_space<vmem>>, vector<1x1x128xf32>
      %48 = vector.shape_cast %47 : vector<1x1x128xf32> to vector<1x128xf32>
      %49 = vector.shape_cast %46 : vector<1x128xf32> to vector<1x1x128xf32>
      tpu.vector_store %arg4[%c0_25, %c2, %c0_26], %49 {strides = array<i32>} : memref<1x3x128xf32, #tpu.memory_space<vmem>>, vector<1x1x128xf32>,
    } else {
    }
    return
  }
  func.func @transform_0(%arg0: i32, %arg1: i32) -> (i32, i32) {
    %c1_i32 = arith.constant 1 : i32
    %0 = arith.muli %arg0, %c1_i32 : i32
    %1 = arith.addi %0, %arg1 : i32
    %c0_i32 = arith.constant 0 : i32
    %2 = arith.minsi %1, %c0_i32 : i32
    %c0_i32_0 = arith.constant 0 : i32
    %c0_i32_1 = arith.constant 0 : i32
    return %2, %c0_i32_0 : i32, i32
  }
  func.func @transform_1(%arg0: i32, %arg1: i32) -> (i32, i32) {
    %c1_i32 = arith.constant 1 : i32
    %0 = arith.muli %arg0, %c1_i32 : i32
    %1 = arith.addi %0, %arg1 : i32
    %c0_i32 = arith.constant 0 : i32
    %2 = arith.minsi %1, %c0_i32 : i32
    %c0_i32_0 = arith.constant 0 : i32
    %c0_i32_1 = arith.constant 0 : i32
    return %2, %c0_i32_0 : i32, i32
  }
  func.func @transform_2(%arg0: i32, %arg1: i32) -> (i32, i32, i32) {
    %c0_i32 = arith.constant 0 : i32
    %c0_i32_0 = arith.constant 0 : i32
    %c0_i32_1 = arith.constant 0 : i32
    return %arg0, %c0_i32, %c0_i32_0 : i32, i32, i32
  }
}

</mosaic_0001>

<bundles_post_ra>
// kernel: tpu_custom_call.1
= control target key start
LH: loop header
LB: loop body
LE: loop exit
PB: predicated region body
PF: predicated region fallthrough
CT: control target
= control target key end

     0   :  { %7 = vsyncpa [#allocation6], 0  ;;  %s556_s0 = inlined_call_operand.hbm [shape: f32[32,128], index: 0, kind: input, shape index: {}]   ;;  %s557_s1 = inlined_call_operand.hbm [shape: f32[32,128], index: 1, kind: input, shape index: {}]   ;;  %s558_s2 = inlined_call_operand.vmem [shape: f32[1,3,128], index: 2, kind: output, shape index: {}]  }
   0x1   :  { %8 = vsyncpa [#allocation8], 0  ;;  %s406_s9 = smov [#allocation5]   ;;  %s358_s13 = scalar_lea.hbm %s556_s0, 512 }
   0x2   :  { %s20_s10 = sshll.u32 %s406_s9, 4  ;;  %p359_p0 = scmp.ne.s32.totalorder %s556_s0, %s358_s13  ;;  %s21_s10 = int_to_ptr.vmem [resolvable:$true] %s20_s10 }
   0x3   :  { %p362_p1 = scmp.lt.u32.totalorder %s358_s13, %s556_s0 }
   0x5   :  { %p364_p2 = pnand %p362_p1, %p359_p0 }
   0x7   :  { %367 = shalt.err (!%p364_p2)
}
   0x8   :  { %s368_s18 = scalar_lea.vmem %s21_s10, 512  ;;  %p373_p4 = scmp.lt.s32.totalorder %s21_s10, %s21_s10 }
   0x9   :  { %p369_p3 = scmp.ne.s32.totalorder %s21_s10, %s368_s18  ;;  %p374_p5 = scmp.lt.s32.totalorder %s368_s18, %s368_s18 }
   0xb   :  { %p375_p6 = por %p374_p5, %p373_p4 }
   0xd   :  { %p376_p7 = pnand %p375_p6, %p369_p3 }
   0xf   :  { %379 = shalt.err (!%p376_p7)
}
  0x10   :  { %s407_s19 = smov 128   ;;  %s408_s20 = smov 8  }
  0x11   :  { %26 = dma.hbm_to_vmem [thread:$0]  %s556_s0, 512, %s21_s10, [#allocation6], %s407_s19, %s407_s19, %s408_s20  }
  0x12   :  { %s409_s23 = smov [#allocation7]   ;;  %s380_s27 = scalar_lea.hbm %s557_s1, 512 }
  0x13   :  { %s38_s24 = sshll.u32 %s409_s23, 4  ;;  %p381_p8 = scmp.ne.s32.totalorder %s557_s1, %s380_s27  ;;  %s39_s24 = int_to_ptr.vmem [resolvable:$true] %s38_s24 }
  0x14   :  { %p384_p9 = scmp.lt.u32.totalorder %s380_s27, %s557_s1 }
  0x16   :  { %p386_p10 = pnand %p384_p9, %p381_p8 }
  0x18   :  { %389 = shalt.err (!%p386_p10)
}
  0x19   :  { %s390_s4 = scalar_lea.vmem %s39_s24, 512  ;;  %p395_p12 = scmp.lt.s32.totalorder %s39_s24, %s39_s24 }
  0x1a   :  { %p391_p11 = scmp.ne.s32.totalorder %s39_s24, %s390_s4  ;;  %p396_p13 = scmp.lt.s32.totalorder %s390_s4, %s390_s4 }
  0x1c   :  { %p397_p0 = por %p396_p13, %p395_p12 }
  0x1e   :  { %p398_p1 = pnand %p397_p0, %p391_p11 }
  0x20   :  { %401 = shalt.err (!%p398_p1)
}
  0x21   :  { %44 = dma.hbm_to_vmem [thread:$0]  %s557_s1, 512, %s39_s24, [#allocation8], %s407_s19, %s407_s19, %s408_s20  }
  0x22   :  { %402 = dma.done.wait [#allocation6], 512  }
  0x23   :  { %403 = vsyncadd [#allocation6], 4294966784 }
  0x24   :  { %404 = dma.done.wait [#allocation8], 512  }
  0x25   :  { %405 = vsyncadd [#allocation8], 4294966784  ;;  %v210_v0 = vlaneseq  ;;  %v449_v4 = vld [vmem:[#allocation5] sm:$0xff]  ;;  %v451_v5 = vld [vmem:[#allocation5 + $0x8] sm:$0xff] }
  0x26   :  { %v453_v7 = vld [vmem:[#allocation5 + $0x10] sm:$0xff]  ;;  %v455_v8 = vld [vmem:[#allocation5 + $0x18] sm:$0xff]  ;;  %v91_v12 = vand.u32 2147483647, %v449_v4  ;;  %v92_v13 = vand.u32 2147483647, %v451_v5 }
  0x27   :  { %v211_v1 = vshrl.u32 %v210_v0, 7  ;;  %v216_v9 = vand.u32 127, %v210_v0  ;;  %v93_v15 = vand.u32 2147483647, %v453_v7  ;;  %v94_v16 = vand.u32 2147483647, %v455_v8 }
  0x28   :  { %v95_v17 = vsub.f32 0.0, %v91_v12  ;;  %v96_v19 = vsub.f32 0.0, %v92_v13  ;;  %v469_v30 = vld [vmem:[#allocation7] sm:$0xff]  ;;  %v471_v31 = vld [vmem:[#allocation7 + $0x8] sm:$0xff]  ;;  %v476_v32 = vld [vmem:[#allocation7 + $0x10] sm:$0xff]  ;;  %v83_v54 = vsub.f32 0.0, %v449_v4 }
  0x29   :  { %v212_v2 = vadd.s32 8, %v211_v1  ;;  %v213_v3 = vadd.s32 16, %v211_v1  ;;  %v214_v6 = vadd.s32 24, %v211_v1  ;;  %v218_v10 = vmul.u32 128, %v211_v1  ;;  %v485_v35 = vld [vmem:[#allocation7 + $0x18] sm:$0xff] }
  0x2a   :  { %v97_v22 = vsub.f32 0.0, %v93_v15  ;;  %v98_v23 = vsub.f32 0.0, %v94_v16  ;;  %v99_v24 = vmul.f32 1.442695, %v95_v17  ;;  %v101_v25 = vmul.f32 1.442695, %v96_v19 }
  0x2b   :  { %v219_v11 = vmul.u32 128, %v212_v2  ;;  %v220_v14 = vmul.u32 128, %v213_v3  ;;  %v461_v20 = vadd.s32 %v218_v10, %v216_v9  ;;  %v84_v55 = vsub.f32 0.0, %v451_v5 }
  0x2c   :  { %v221_v18 = vmul.u32 128, %v214_v6  ;;  %342 = vpow2.f32 %v99_v24  ;;  %v103_v27 = vmul.f32 1.442695, %v97_v22  ;;  %v105_v28 = vmul.f32 1.442695, %v98_v23 }
  0x2d   :  { %v463_v21 = vadd.s32 %v219_v11, %v216_v9  ;;  %v465_v26 = vadd.s32 %v220_v14, %v216_v9  ;;  %344 = vpow2.f32 %v101_v25  ;;  %vm231_vm0 = vcmp.lt.s32.totalorder %v461_v20, 2048 }
  0x2e   :  { %v467_v29 = vadd.s32 %v221_v18, %v216_v9  ;;  %346 = vpow2.f32 %v103_v27  ;;  %v243_v33 = vsel %vm231_vm0, %v469_v30, 0.0  ;;  %v85_v57 = vsub.f32 0.0, %v453_v7 }
  0x2f   :  { %vm232_vm1 = vcmp.lt.s32.totalorder %v463_v21, 2048  ;;  %vm233_vm2 = vcmp.lt.s32.totalorder %v465_v26, 2048  ;;  %348 = vpow2.f32 %v105_v28  ;;  %v86_v60 = vsub.f32 0.0, %v455_v8 }
  0x30   :  { %vm234_vm3 = vcmp.lt.s32.totalorder %v467_v29, 2048  ;;  %v244_v34 = vsel %vm232_vm1, %v471_v31, 0.0  ;;  %v245_v36 = vsel %vm233_vm2, %v476_v32, 0.0  ;;  %v147_v2 = vmul.f32 %v469_v30, %v449_v4 }
  0x31   :  { %v318_v37 = vadd.f32 %v244_v34, %v243_v33  ;;  %v246_v38 = vsel %vm234_vm3, %v485_v35, 0.0  ;;  %v148_v3 = vmul.f32 %v471_v31, %v451_v5  ;;  %v87_v6 = vmax.f32 %v83_v54, 0.0 }
  0x32   :  { %v88_v9 = vmax.f32 %v84_v55, 0.0  ;;  %v89_v12 = vmax.f32 %v85_v57, 0.0  ;;  %v149_v15 = vmul.f32 %v476_v32, %v453_v7  ;;  %v90_v24 = vmax.f32 %v86_v60, 0.0 }
  0x33   :  { %v319_v39 = vadd.f32 %v318_v37, %v245_v36  ;;  %v150_v37 = vmul.f32 %v485_v35, %v455_v8 }
  0x35   :  { %v320_v40 = vadd.f32 %v319_v39, %v246_v38  ;;  %v151_v38 = vsub.f32 %v449_v4, %v147_v2 }
  0x36   :  { %v343_v42 = vpop.eup %342 }
  0x37   :  { %v321_v41 = vrot.slane %v320_v40, 4  ;;  %v345_v43 = vpop.eup %344  ;;  %v107_v44 = vadd.f32 1.0, %v343_v42  ;;  %v110_v50 = vmul.f32 -0.5, %v343_v42  ;;  %v113_v61 = vand.u32 2147483647, %v343_v42 }
  0x38   :  { %v347_v45 = vpop.eup %346  ;;  %v116_v46 = vadd.f32 1.0, %v345_v43  ;;  %v119_v51 = vmul.f32 -0.5, %v345_v43  ;;  %v122_v0 = vand.u32 2147483647, %v345_v43 }
  0x39   :  { %v349_v47 = vpop.eup %348  ;;  %350 = vlog2.f32 %v107_v44  ;;  %v125_v48 = vadd.f32 1.0, %v347_v45  ;;  %v322_v49 = vadd.f32 %v321_v41, %v320_v40  ;;  %v128_v53 = vmul.f32 -0.5, %v347_v45 }
  0x3a   :  { %352 = vlog2.f32 %v116_v46  ;;  %v134_v52 = vadd.f32 1.0, %v349_v47  ;;  %v111_v58 = vadd.f32 1.0, %v110_v50  ;;  %v137_v59 = vmul.f32 -0.5, %v349_v47 }
  0x3b   :  { %354 = vlog2.f32 %v125_v48  ;;  %v323_v56 = vrot.slane %v322_v49, 2  ;;  %v120_v62 = vadd.f32 1.0, %v119_v51  ;;  %v129_v1 = vadd.f32 1.0, %v128_v53 }
  0x3c   :  { %356 = vlog2.f32 %v134_v52  ;;  %v131_v10 = vand.u32 2147483647, %v347_v45  ;;  %v112_v13 = vmul.f32 %v343_v42, %v111_v58  ;;  %v138_v14 = vadd.f32 1.0, %v137_v59 }
  0x3d   :  { %v324_v63 = vadd.f32 %v323_v56, %v322_v49  ;;  %vm503_vm4 = vcmp.lt.f32.partialorder %v113_v61, 0.0004427343  ;;  %v121_v18 = vmul.f32 %v345_v43, %v120_v62  ;;  %v140_v19 = vand.u32 2147483647, %v349_v47 }
  0x3e   :  { %vm507_vm5 = vcmp.lt.f32.partialorder %v122_v0, 0.0004427343  ;;  %v130_v28 = vmul.f32 %v347_v45, %v129_v1  ;;  %vm511_vm6 = vcmp.lt.f32.partialorder %v131_v10, 0.0004427343  ;;  %v139_v41 = vmul.f32 %v349_v47, %v138_v14 }
  0x3f   :  { %v325_v11 = vrot.slane %v324_v63, 1  ;;  %v152_v42 = vsub.f32 %v451_v5, %v148_v3  ;;  %vm141_vm7 = vcmp.lt.f32.partialorder %v140_v19, 0.0004427343  ;;  %v153_v46 = vsub.f32 %v453_v7, %v149_v15 }
  0x40   :  { %v154_v51 = vsub.f32 %v455_v8, %v150_v37 }
  0x41   :  { %v326_v22 = vadd.f32 %v325_v11, %v324_v63 }
  0x43   :  { %v351_v16 = vpop.eup %350  ;;  %327 = vst [vmem:[%s558_s2 + $0x2] sm:$0x1] %v326_v22 }
  0x44   :  { %v353_v23 = vpop.eup %352  ;;  %v109_v25 = vmul.f32 0.6931472, %v351_v16 }
  0x45   :  { %v355_v33 = vpop.eup %354  ;;  %v118_v34 = vmul.f32 0.6931472, %v353_v23 }
  0x46   :  { %v115_v39 = vsel %vm503_vm4, %v112_v13, %v109_v25  ;;  %v127_v40 = vmul.f32 0.6931472, %v355_v33  ;;  %v357_v43 = vpop.eup %356 }
  0x47   :  { %v124_v44 = vsel %vm507_vm5, %v121_v18, %v118_v34  ;;  %v143_v45 = vadd.f32 %v115_v39, %v87_v6  ;;  %v136_v48 = vmul.f32 0.6931472, %v357_v43 }
  0x48   :  { %v133_v4 = vsel %vm511_vm6, %v130_v28, %v127_v40  ;;  %v144_v49 = vadd.f32 %v124_v44, %v88_v9 }
  0x49   :  { %v145_v50 = vadd.f32 %v133_v4, %v89_v12  ;;  %v155_v52 = vadd.f32 %v151_v38, %v143_v45  ;;  %v159_v47 = vmul.f32 %v143_v45, %v469_v30  ;;  %v142_v5 = vsel %vm141_vm7, %v139_v41, %v136_v48 }
  0x4a   :  { %v156_v53 = vadd.f32 %v152_v42, %v144_v49  ;;  %v160_v54 = vmul.f32 %v144_v49, %v471_v31  ;;  %v146_v55 = vadd.f32 %v142_v5, %v90_v24 }
  0x4b   :  { %v157_v56 = vadd.f32 %v153_v46, %v145_v50  ;;  %v235_v7 = vsel %vm231_vm0, %v155_v52, 0.0  ;;  %v161_v57 = vmul.f32 %v145_v50, %v476_v32  ;;  %v239_v8 = vsel %vm231_vm0, %v159_v47, 0.0 }
  0x4c   :  { %v236_v58 = vsel %vm232_vm1, %v156_v53, 0.0  ;;  %v240_v30 = vsel %vm232_vm1, %v160_v54, 0.0  ;;  %v158_v59 = vadd.f32 %v154_v51, %v146_v55  ;;  %v162_v61 = vmul.f32 %v146_v55, %v485_v35 }
  0x4d   :  { %v237_v31 = vsel %vm233_vm2, %v157_v56, 0.0  ;;  %v290_v60 = vadd.f32 %v236_v58, %v235_v7  ;;  %v241_v62 = vsel %vm233_vm2, %v161_v57, 0.0  ;;  %v304_v32 = vadd.f32 %v240_v30, %v239_v8 }
  0x4e   :  { %v238_v63 = vsel %vm234_vm3, %v158_v59, 0.0  ;;  %v242_v20 = vsel %vm234_vm3, %v162_v61, 0.0 }
  0x4f   :  { %v291_v0 = vadd.f32 %v290_v60, %v237_v31  ;;  %v305_v21 = vadd.f32 %v304_v32, %v241_v62 }
  0x51   :  { %v292_v1 = vadd.f32 %v291_v0, %v238_v63  ;;  %v306_v2 = vadd.f32 %v305_v21, %v242_v20 }
  0x53   :  { %v293_v3 = vrot.slane %v292_v1, 4  ;;  %v307_v6 = vrot.slane %v306_v2, 4 }
  0x55   :  { %v294_v9 = vadd.f32 %v293_v3, %v292_v1  ;;  %v308_v10 = vadd.f32 %v307_v6, %v306_v2 }
  0x57   :  { %v295_v11 = vrot.slane %v294_v9, 2  ;;  %v309_v35 = vrot.slane %v308_v10, 2 }
  0x59   :  { %v296_v12 = vadd.f32 %v295_v11, %v294_v9  ;;  %v310_v26 = vadd.f32 %v309_v35, %v308_v10 }
  0x5b   :  { %v297_v13 = vrot.slane %v296_v12, 1  ;;  %v311_v14 = vrot.slane %v310_v26, 1 }
  0x5d   :  { %v298_v15 = vadd.f32 %v297_v13, %v296_v12  ;;  %v312_v16 = vadd.f32 %v311_v14, %v310_v26 }
  0x5f   :  { %299 = vst [vmem:[%s558_s2] sm:$0x1] %v298_v15  ;;  %313 = vst [vmem:[%s558_s2 + $0x1] sm:$0x1] %v312_v16 }
  0x60   :  { %332 = vsyncpa [#allocation6], 1 }
  0x61   :  { %333 = vsyncpa [#allocation8], 1 }

</bundles_post_ra>
